<compile_context>
chip_gen: v5e
topology: v5e:2x2
jax: 0.10.0
libtpu: 0.0.40
codegen_flags: <defaults>
</compile_context>

<pallas_src>
import jax
import jax.numpy as jnp
from jax.experimental import pallas as pl
from jax.experimental.pallas import tpu as pltpu


def _round_up(x: int, m: int) -> int:
    return ((x + m - 1) // m) * m


# ---------------------------------------------------------------------------
# Fused Pallas kernel: the whole encoder+decoder MLP stack in one body.
# ---------------------------------------------------------------------------
def _make_fused_ae_kernel(n_layers, sigmoid_flags, compute_dtype):
    """Returns kernel with signature (x_ref, w0, b0, ..., w{n-1}, b{n-1}, o_ref)."""

    def kernel(*refs):
        x_ref = refs[0]
        o_ref = refs[-1]
        wb = refs[1:-1]

        # Input tile already arrives in compute_dtype (pre-cast in the wrapper).
        h = x_ref[...]                                       # (bt, d_in)
        for li in range(n_layers):
            w_ref = wb[2 * li]                               # compute_dtype weights
            b_ref = wb[2 * li + 1]                           # f32 bias (1, dout)
            # MXU matmul with f32 accumulation (bf16 operands on the fast path).
            y = jnp.dot(h, w_ref[...], preferred_element_type=jnp.float32)
            y = y + b_ref[...]                               # f32 bias add (VPU)
            if sigmoid_flags[li]:
                y = jax.nn.sigmoid(y)                        # f32 (EUP)
            # Re-cast activations for the next MXU pass; no-op on the f32 path
            # and skipped entirely after the last layer.
            h = y if li == n_layers - 1 else y.astype(compute_dtype)
        o_ref[...] = h.astype(o_ref.dtype)                   # lane-dense store

    return kernel


def linear_ae_forward(params, x, input_dims, *,
                      compute_dtype=jnp.bfloat16,
                      out_dtype=jnp.float32,
                      batch_tile=512):
    """x: (B, H, W) float32 -> (B, H, W) out_dtype (LinearAE.forward)."""
    H, W = input_dims
    B = x.shape[0]
    d_in = H * W

    # ---- Layer list (forward order), with encoder_out folded into decoder[0].
    # Encoder hidden layers (sigmoid), then encoder out (no act) folded into
    # decoder hidden[0] (sigmoid after), remaining decoder hidden (sigmoid),
    # decoder out (no act).  Fold: sigmoid((h W_eo + b_eo) W_d0 + b_d0)
    #                            = sigmoid(h (W_eo W_d0) + (b_eo W_d0 + b_d0)).
    enc_hidden = list(params["encoder"])
    dec_hidden = list(params["decoder"])
    w_eo, b_eo = params["encoder_out"]
    w_d0, b_d0 = dec_hidden[0]
    folded = (w_eo @ w_d0, b_eo @ w_d0 + b_d0)
    layers = enc_hidden + [folded] + dec_hidden[1:] + [params["decoder_out"]]
    sigmoid_flags = ([True] * len(enc_hidden) + [True]
                     + [True] * (len(dec_hidden) - 1) + [False])
    n_layers = len(layers)
    d_out = layers[-1][0].shape[1]          # H * W

    # ---- Input stream: cast once in the wrapper (halves HBM bytes on bf16).
    xf = x.reshape(B, d_in).astype(compute_dtype)
    B_eff = B
    if B < 8:
        # Only sub-sublane batches get padded (trivial); large batches rely on
        # Pallas edge-block masking instead of whole-array pad / slice copies.
        B_eff = 8
        xf = jnp.pad(xf, ((0, B_eff - B), (0, 0)))

    # ---- Batch tiling: big tiles (overhead amortization), >= 2 grid steps
    # whenever possible so both v7x TensorCores get work, tiles multiple of 8.
    batch_tile = max(8, _round_up(batch_tile, 8))
    b_ceil = _round_up(B_eff, 8)
    bt = min(batch_tile, b_ceil)
    if b_ceil > 8 and pl.cdiv(B_eff, bt) < 2:
        bt = _round_up(pl.cdiv(b_ceil, 2), 8)
    grid = (pl.cdiv(B_eff, bt),)

    in_specs = [pl.BlockSpec((bt, d_in), lambda i: (i, 0))]
    operands = [xf]
    for w, b in layers:
        din, dout = w.shape
        # Full-array blocks with constant index_maps -> weights/biases are
        # DMA'd once and stay VMEM-resident across all batch tiles.
        in_specs.append(pl.BlockSpec((din, dout), lambda i: (0, 0)))
        in_specs.append(pl.BlockSpec((1, dout), lambda i: (0, 0)))
        operands.append(jnp.asarray(w, jnp.float32).astype(compute_dtype))
        operands.append(jnp.asarray(b, jnp.float32))   # bias stays f32

    kernel = _make_fused_ae_kernel(n_layers, tuple(sigmoid_flags), compute_dtype)

    out = pl.pallas_call(
        kernel,
        out_shape=jax.ShapeDtypeStruct((B_eff, d_out), out_dtype),
        grid=grid,
        in_specs=in_specs,
        out_specs=pl.BlockSpec((bt, d_out), lambda i: (i, 0)),
        compiler_params=pltpu.CompilerParams(
            # Pure batch axis -> "parallel": lets v7x shard it over its 2 TCs.
            dimension_semantics=("parallel",)),
    )(*operands)

    if B_eff != B:
        out = out[:B]
    return out.reshape(B, H, W)


# ---------------------------------------------------------------------------
# Parameter construction (deterministic, torch.nn.Linear-style init).
# ---------------------------------------------------------------------------
def _init_linear(key, din, dout):
    """Returns (W (din, dout), b (1, dout)) with U(-1/sqrt(din), 1/sqrt(din))."""
    kw, kb = jax.random.split(key)
    bound = 1.0 / jnp.sqrt(jnp.float32(din))
    w = jax.random.uniform(kw, (din, dout), jnp.float32, -bound, bound)
    b = jax.random.uniform(kb, (1, dout), jnp.float32, -bound, bound)
    return w, b


def build_linear_ae_params(key, input_dims, encoding_dim, h_dims):
    """Mirrors LinearAE.__init__ parameter shapes (weights stored transposed)."""
    H, W = input_dims
    params = {"encoder": [], "decoder": []}

    # Encoder: dims = [H*W, *h_dims, encoding_dim]; hidden layers + out_layer.
    enc_dims = [H * W, *h_dims, encoding_dim]
    for i in range(len(enc_dims) - 1):
        key, sub = jax.random.split(key)
        params["encoder"].append(_init_linear(sub, enc_dims[i], enc_dims[i + 1]))
    key, sub = jax.random.split(key)
    params["encoder_out"] = _init_linear(sub, enc_dims[-1], encoding_dim)

    # Decoder: dims = [encoding_dim, *h_dims, H*W]; hidden layers + out_layer.
    dec_dims = [encoding_dim, *h_dims, H * W]
    for i in range(len(dec_dims) - 1):
        key, sub = jax.random.split(key)
        params["decoder"].append(_init_linear(sub, dec_dims[i], dec_dims[i + 1]))
    key, sub = jax.random.split(key)
    params["decoder_out"] = _init_linear(sub, dec_dims[-1], H * W)

    return params


# Pure-JAX reference (unfolded params, exactly the PyTorch forward order).
def _reference_forward(params, x, input_dims):
    H, W = input_dims
    B = x.shape[0]
    h = x.reshape(B, -1)
    for w, b in params["encoder"]:
        h = jax.nn.sigmoid(h @ w + b)
    w, b = params["encoder_out"]
    h = h @ w + b
    for w, b in params["decoder"]:
        h = jax.nn.sigmoid(h @ w + b)
    w, b = params["decoder_out"]
    h = h @ w + b
    return h.reshape(B, H, W)


if __name__ == "__main__":
    # Small shapes consistent with the module: input_dim=(16, 16),
    # encoding_dim=8, h_dims=[32].
    input_dims = (16, 16)
    encoding_dim = 8
    h_dims = [32]

    root = jax.random.PRNGKey(0)
    k_params, k_x, k_x2 = jax.random.split(root, 3)
    params = build_linear_ae_params(k_params, input_dims, encoding_dim, h_dims)

    # --- tiny batch (B=2): exercises the sub-sublane pad path ---------------
    B = 2
    x = jax.random.uniform(k_x, (B, *input_dims), jnp.float32)
    ref = _reference_forward(params, x, input_dims)

    # Full-f32 path (tight tolerance vs. pure-JAX reference).
    out_f32 = jax.block_until_ready(
        linear_ae_forward(params, x, input_dims, compute_dtype=jnp.float32))
    assert out_f32.shape == (B, *input_dims)
    assert jnp.allclose(out_f32, ref, atol=1e-5, rtol=1e-5)

    # bf16-MXU-operand fast path (default; f32 accumulate/bias/sigmoid).
    out_bf16 = jax.block_until_ready(
        linear_ae_forward(params, x, input_dims, compute_dtype=jnp.bfloat16))
    assert out_bf16.shape == (B, *input_dims)
    assert jnp.allclose(out_bf16, ref, atol=5e-2, rtol=5e-2)

    # --- larger batch (B=300): exercises multi-step grid + partial tail block
    B2 = 300
    x2 = jax.random.uniform(k_x2, (B2, *input_dims), jnp.float32)
    ref2 = _reference_forward(params, x2, input_dims)
    out2 = jax.block_until_ready(
        linear_ae_forward(params, x2, input_dims, compute_dtype=jnp.float32))
    assert out2.shape == (B2, *input_dims)
    assert jnp.allclose(out2, ref2, atol=1e-5, rtol=1e-5)

    print("KERNEL_OK")
</pallas_src>

<mosaic_0001>
module attributes {stable_mosaic.version = 11 : i64} {
  func.func @kernel(%arg0: i32, %arg1: memref<8x256xf32, #tpu.memory_space<vmem>>, %arg2: memref<256x32xf32, #tpu.memory_space<vmem>>, %arg3: memref<1x32xf32, #tpu.memory_space<vmem>>, %arg4: memref<32x8xf32, #tpu.memory_space<vmem>>, %arg5: memref<1x8xf32, #tpu.memory_space<vmem>>, %arg6: memref<8x32xf32, #tpu.memory_space<vmem>>, %arg7: memref<1x32xf32, #tpu.memory_space<vmem>>, %arg8: memref<32x256xf32, #tpu.memory_space<vmem>>, %arg9: memref<1x256xf32, #tpu.memory_space<vmem>>, %arg10: memref<256x256xf32, #tpu.memory_space<vmem>>, %arg11: memref<1x256xf32, #tpu.memory_space<vmem>>, %arg12: memref<8x256xf32, #tpu.memory_space<vmem>>) attributes {dimension_semantics = [#tpu.dimension_semantics<parallel>], iteration_bounds = array<i64: 1>, scalar_prefetch = 0 : i64, scratch_operands = 0 : i64, tpu.core_type = #tpu.core_type<tc>, window_params = [{transform_indices = @transform_0, window_bounds = array<i64: 8, 256>}, {pipeline_mode = #tpu.pipeline_mode<synchronous>, transform_indices = @transform_1, window_bounds = array<i64: 256, 32>}, {pipeline_mode = #tpu.pipeline_mode<synchronous>, transform_indices = @transform_2, window_bounds = array<i64: 1, 32>}, {pipeline_mode = #tpu.pipeline_mode<synchronous>, transform_indices = @transform_3, window_bounds = array<i64: 32, 8>}, {pipeline_mode = #tpu.pipeline_mode<synchronous>, transform_indices = @transform_4, window_bounds = array<i64: 1, 8>}, {pipeline_mode = #tpu.pipeline_mode<synchronous>, transform_indices = @transform_5, window_bounds = array<i64: 8, 32>}, {pipeline_mode = #tpu.pipeline_mode<synchronous>, transform_indices = @transform_6, window_bounds = array<i64: 1, 32>}, {pipeline_mode = #tpu.pipeline_mode<synchronous>, transform_indices = @transform_7, window_bounds = array<i64: 32, 256>}, {pipeline_mode = #tpu.pipeline_mode<synchronous>, transform_indices = @transform_8, window_bounds = array<i64: 1, 256>}, {pipeline_mode = #tpu.pipeline_mode<synchronous>, transform_indices = @transform_9, window_bounds = array<i64: 256, 256>}, {pipeline_mode = #tpu.pipeline_mode<synchronous>, transform_indices = @transform_10, window_bounds = array<i64: 1, 256>}, {transform_indices = @transform_11, window_bounds = array<i64: 8, 256>}]} {
    %c0 = arith.constant 0 : index
    %c0_0 = arith.constant 0 : index
    %0 = vector.load %arg1[%c0, %c0_0] : memref<8x256xf32, #tpu.memory_space<vmem>>, vector<8x256xf32>
    %c0_1 = arith.constant 0 : index
    %c0_2 = arith.constant 0 : index
    %1 = vector.load %arg2[%c0_1, %c0_2] : memref<256x32xf32, #tpu.memory_space<vmem>>, vector<256x32xf32>
    %cst = arith.constant dense<0.000000e+00> : vector<8x32xf32>
    %2 = tpu.matmul %0, %1, %cst {dimension_numbers = #tpu.dot_dimension_numbers<[1], [0], [0], [1], [0, 0, 1, 1], [], []>} : vector<8x256xf32>, vector<256x32xf32>, vector<8x32xf32> -> vector<8x32xf32>
    %c0_3 = arith.constant 0 : index
    %c0_4 = arith.constant 0 : index
    %3 = vector.load %arg3[%c0_3, %c0_4] : memref<1x32xf32, #tpu.memory_space<vmem>>, vector<1x32xf32>
    %4 = vector.broadcast %3 : vector<1x32xf32> to vector<8x32xf32>
    %5 = arith.addf %2, %4 : vector<8x32xf32>
    %6 = arith.negf %5 : vector<8x32xf32>
    %7 = math.exp %6 : vector<8x32xf32>
    %cst_5 = arith.constant 1.000000e+00 : f32
    %8 = vector.broadcast %cst_5 : f32 to vector<8x32xf32>
    %9 = arith.addf %8, %7 : vector<8x32xf32>
    %10 = arith.divf %8, %9 : vector<8x32xf32>
    %c0_6 = arith.constant 0 : index
    %c0_7 = arith.constant 0 : index
    %11 = vector.load %arg4[%c0_6, %c0_7] : memref<32x8xf32, #tpu.memory_space<vmem>>, vector<32x8xf32>
    %cst_8 = arith.constant dense<0.000000e+00> : vector<8x8xf32>
    %12 = tpu.matmul %10, %11, %cst_8 {dimension_numbers = #tpu.dot_dimension_numbers<[1], [0], [0], [1], [0, 0, 1, 1], [], []>} : vector<8x32xf32>, vector<32x8xf32>, vector<8x8xf32> -> vector<8x8xf32>
    %c0_9 = arith.constant 0 : index
    %c0_10 = arith.constant 0 : index
    %13 = vector.load %arg5[%c0_9, %c0_10] : memref<1x8xf32, #tpu.memory_space<vmem>>, vector<1x8xf32>
    %14 = vector.broadcast %13 : vector<1x8xf32> to vector<8x8xf32>
    %15 = arith.addf %12, %14 : vector<8x8xf32>
    %16 = arith.negf %15 : vector<8x8xf32>
    %17 = math.exp %16 : vector<8x8xf32>
    %cst_11 = arith.constant 1.000000e+00 : f32
    %18 = vector.broadcast %cst_11 : f32 to vector<8x8xf32>
    %19 = arith.addf %18, %17 : vector<8x8xf32>
    %20 = arith.divf %18, %19 : vector<8x8xf32>
    %c0_12 = arith.constant 0 : index
    %c0_13 = arith.constant 0 : index
    %21 = vector.load %arg6[%c0_12, %c0_13] : memref<8x32xf32, #tpu.memory_space<vmem>>, vector<8x32xf32>
    %cst_14 = arith.constant dense<0.000000e+00> : vector<8x32xf32>
    %22 = tpu.matmul %20, %21, %cst_14 {dimension_numbers = #tpu.dot_dimension_numbers<[1], [0], [0], [1], [0, 0, 1, 1], [], []>} : vector<8x8xf32>, vector<8x32xf32>, vector<8x32xf32> -> vector<8x32xf32>
    %c0_15 = arith.constant 0 : index
    %c0_16 = arith.constant 0 : index
    %23 = vector.load %arg7[%c0_15, %c0_16] : memref<1x32xf32, #tpu.memory_space<vmem>>, vector<1x32xf32>
    %24 = vector.broadcast %23 : vector<1x32xf32> to vector<8x32xf32>
    %25 = arith.addf %22, %24 : vector<8x32xf32>
    %26 = arith.negf %25 : vector<8x32xf32>
    %27 = math.exp %26 : vector<8x32xf32>
    %cst_17 = arith.constant 1.000000e+00 : f32
    %28 = vector.broadcast %cst_17 : f32 to vector<8x32xf32>
    %29 = arith.addf %28, %27 : vector<8x32xf32>
    %30 = arith.divf %28, %29 : vector<8x32xf32>
    %c0_18 = arith.constant 0 : index
    %c0_19 = arith.constant 0 : index
    %31 = vector.load %arg8[%c0_18, %c0_19] : memref<32x256xf32, #tpu.memory_space<vmem>>, vector<32x256xf32>
    %cst_20 = arith.constant dense<0.000000e+00> : vector<8x256xf32>
    %32 = tpu.matmul %30, %31, %cst_20 {dimension_numbers = #tpu.dot_dimension_numbers<[1], [0], [0], [1], [0, 0, 1, 1], [], []>} : vector<8x32xf32>, vector<32x256xf32>, vector<8x256xf32> -> vector<8x256xf32>
    %c0_21 = arith.constant 0 : index
    %c0_22 = arith.constant 0 : index
    %33 = vector.load %arg9[%c0_21, %c0_22] : memref<1x256xf32, #tpu.memory_space<vmem>>, vector<1x256xf32>
    %34 = vector.broadcast %33 : vector<1x256xf32> to vector<8x256xf32>
    %35 = arith.addf %32, %34 : vector<8x256xf32>
    %36 = arith.negf %35 : vector<8x256xf32>
    %37 = math.exp %36 : vector<8x256xf32>
    %cst_23 = arith.constant 1.000000e+00 : f32
    %38 = vector.broadcast %cst_23 : f32 to vector<8x256xf32>
    %39 = arith.addf %38, %37 : vector<8x256xf32>
    %40 = arith.divf %38, %39 : vector<8x256xf32>
    %c0_24 = arith.constant 0 : index
    %c0_25 = arith.constant 0 : index
    %41 = vector.load %arg10[%c0_24, %c0_25] : memref<256x256xf32, #tpu.memory_space<vmem>>, vector<256x256xf32>
    %cst_26 = arith.constant dense<0.000000e+00> : vector<8x256xf32>
    %42 = tpu.matmul %40, %41, %cst_26 {dimension_numbers = #tpu.dot_dimension_numbers<[1], [0], [0], [1], [0, 0, 1, 1], [], []>} : vector<8x256xf32>, vector<256x256xf32>, vector<8x256xf32> -> vector<8x256xf32>
    %c0_27 = arith.constant 0 : index
    %c0_28 = arith.constant 0 : index
    %43 = vector.load %arg11[%c0_27, %c0_28] : memref<1x256xf32, #tpu.memory_space<vmem>>, vector<1x256xf32>
    %44 = vector.broadcast %43 : vector<1x256xf32> to vector<8x256xf32>
    %45 = arith.addf %42, %44 : vector<8x256xf32>
    %c0_29 = arith.constant 0 : index
    %c0_30 = arith.constant 0 : index
    %46 = vector.load %arg12[%c0_29, %c0_30] : memref<8x256xf32, #tpu.memory_space<vmem>>, vector<8x256xf32>
    tpu.vector_store %arg12[%c0_29, %c0_30], %45 {strides = array<i32>} : memref<8x256xf32, #tpu.memory_space<vmem>>, vector<8x256xf32>,
    return
  }
  func.func @transform_0(%arg0: i32) -> (i32, i32) {
    %c0_i32 = arith.constant 0 : i32
    %c0_i32_0 = arith.constant 0 : i32
    return %arg0, %c0_i32 : i32, i32
  }
  func.func @transform_1(%arg0: i32) -> (i32, i32) {
    %c0_i32 = arith.constant 0 : i32
    %c0_i32_0 = arith.constant 0 : i32
    %c0_i32_1 = arith.constant 0 : i32
    return %c0_i32, %c0_i32_0 : i32, i32
  }
  func.func @transform_2(%arg0: i32) -> (i32, i32) {
    %c0_i32 = arith.constant 0 : i32
    %c0_i32_0 = arith.constant 0 : i32
    %c0_i32_1 = arith.constant 0 : i32
    return %c0_i32, %c0_i32_0 : i32, i32
  }
  func.func @transform_3(%arg0: i32) -> (i32, i32) {
    %c0_i32 = arith.constant 0 : i32
    %c0_i32_0 = arith.constant 0 : i32
    %c0_i32_1 = arith.constant 0 : i32
    return %c0_i32, %c0_i32_0 : i32, i32
  }
  func.func @transform_4(%arg0: i32) -> (i32, i32) {
    %c0_i32 = arith.constant 0 : i32
    %c0_i32_0 = arith.constant 0 : i32
    %c0_i32_1 = arith.constant 0 : i32
    return %c0_i32, %c0_i32_0 : i32, i32
  }
  func.func @transform_5(%arg0: i32) -> (i32, i32) {
    %c0_i32 = arith.constant 0 : i32
    %c0_i32_0 = arith.constant 0 : i32
    %c0_i32_1 = arith.constant 0 : i32
    return %c0_i32, %c0_i32_0 : i32, i32
  }
  func.func @transform_6(%arg0: i32) -> (i32, i32) {
    %c0_i32 = arith.constant 0 : i32
    %c0_i32_0 = arith.constant 0 : i32
    %c0_i32_1 = arith.constant 0 : i32
    return %c0_i32, %c0_i32_0 : i32, i32
  }
  func.func @transform_7(%arg0: i32) -> (i32, i32) {
    %c0_i32 = arith.constant 0 : i32
    %c0_i32_0 = arith.constant 0 : i32
    %c0_i32_1 = arith.constant 0 : i32
    return %c0_i32, %c0_i32_0 : i32, i32
  }
  func.func @transform_8(%arg0: i32) -> (i32, i32) {
    %c0_i32 = arith.constant 0 : i32
    %c0_i32_0 = arith.constant 0 : i32
    %c0_i32_1 = arith.constant 0 : i32
    return %c0_i32, %c0_i32_0 : i32, i32
  }
  func.func @transform_9(%arg0: i32) -> (i32, i32) {
    %c0_i32 = arith.constant 0 : i32
    %c0_i32_0 = arith.constant 0 : i32
    %c0_i32_1 = arith.constant 0 : i32
    return %c0_i32, %c0_i32_0 : i32, i32
  }
  func.func @transform_10(%arg0: i32) -> (i32, i32) {
    %c0_i32 = arith.constant 0 : i32
    %c0_i32_0 = arith.constant 0 : i32
    %c0_i32_1 = arith.constant 0 : i32
    return %c0_i32, %c0_i32_0 : i32, i32
  }
  func.func @transform_11(%arg0: i32) -> (i32, i32) {
    %c0_i32 = arith.constant 0 : i32
    %c0_i32_0 = arith.constant 0 : i32
    return %arg0, %c0_i32 : i32, i32
  }
}

</mosaic_0001>

<bundles_post_ra>
// kernel: tpu_custom_call.1
= control target key start
LH: loop header
LB: loop body
LE: loop exit
PB: predicated region body
PF: predicated region fallthrough
CT: control target
= control target key end

     0   :  { %16 = vsyncpa [#allocation3], 0  ;;  %s832_s0 = inlined_call_operand.vmem [shape: f32[8,256], index: 0, kind: input, shape index: {}]   ;;  %s833_s1 = inlined_call_operand.vmem [shape: f32[256,32], index: 1, kind: input, shape index: {}]   ;;  %s834_s2 = inlined_call_operand.vmem [shape: f32[1,32], index: 2, kind: input, shape index: {}]   ;;  %s835_s3 = inlined_call_operand.vmem [shape: f32[32,8], index: 3, kind: input, shape index: {}]   ;;  %s836_s4 = inlined_call_operand.vmem [shape: f32[1,8], index: 4, kind: input, shape index: {}]   ;;  %s837_s5 = inlined_call_operand.vmem [shape: f32[8,32], index: 5, kind: input, shape index: {}]   ;;  %s838_s6 = inlined_call_operand.vmem [shape: f32[1,32], index: 6, kind: input, shape index: {}]   ;;  %s839_s7 = inlined_call_operand.vmem [shape: f32[32,256], index: 7, kind: input, shape index: {}]   ;;  %s840_s8 = inlined_call_operand.vmem [shape: f32[1,256], index: 8, kind: input, shape index: {}]   ;;  %s841_s9 = inlined_call_operand.hbm [shape: f32[256,256], index: 9, kind: input, shape index: {}]   ;;  %s842_s10 = inlined_call_operand.vmem [shape: f32[1,256], index: 10, kind: input, shape index: {}]   ;;  %s843_s11 = inlined_call_operand.hbm [shape: f32[8,256], index: 11, kind: output, shape index: {}]  }
   0x1   :  { %17 = vsyncpa [#allocation4], 0  ;;  %s40_s19 = sshll.u32 %s841_s9, 4  ;;  %s603_s20 = smov [#allocation2]   ;;  %s41_s19 = int_to_ptr.hbm [resolvable:$true] %s40_s19 }
   0x2   :  { %s42_s21 = sshll.u32 %s603_s20, 4  ;;  %s604_s22 = smov 256   ;;  %s43_s21 = int_to_ptr.vmem [resolvable:$true] %s42_s21 }
   0x3   :  { %s605_s23 = smov 16  }
   0x4   :  { %48 = dma.hbm_to_vmem [thread:$0]  %s41_s19, 8192, %s43_s21, [#allocation3], %s604_s22, %s604_s22, %s605_s23  }
   0x5   :  { %599 = dma.done.wait [#allocation3], 8192  }
   0x6   :  { %600 = vsyncadd [#allocation3], 4294959104  ;;  %v72_v0 = vld [vmem:[%s833_s1 + $0x78] sm:$0xff]  ;;  %v71_v1 = vld [vmem:[%s833_s1 + $0x70] sm:$0xff]  ;;  %vm160_vm3 = vcmask 261120   ;;  %vm208_vm8 = vcmask 64512  }
   0x7   :  { %v88_v2 = vld [vmem:[%s833_s1 + $0xf8] sm:$0xff]  ;;  %93 = vmatpush.msra.mxu0 %v72_v0  ;;  %v87_v3 = vld [vmem:[%s833_s1 + $0xf0] sm:$0xff]  ;;  %v70_v4 = vld [vmem:[%s833_s1 + $0x68] sm:$0xff] }
   0x8   :  { %113 = vmatpush.msra.mxu1 %v88_v2  ;;  %v86_v5 = vld [vmem:[%s833_s1 + $0xe8] sm:$0xff]  ;;  %v69_v6 = vld [vmem:[%s833_s1 + $0x60] sm:$0xff]  ;;  %v68_v8 = vld [vmem:[%s833_s1 + $0x58] sm:$0xff] }
   0x9   :  { %94 = vmatpush.msra.mxu0 %v71_v1  ;;  %v85_v7 = vld [vmem:[%s833_s1 + $0xe0] sm:$0xff]  ;;  %v84_v9 = vld [vmem:[%s833_s1 + $0xd8] sm:$0xff]  ;;  %v67_v10 = vld [vmem:[%s833_s1 + $0x50] sm:$0xff] }
   0xa   :  { %114 = vmatpush.msra.mxu1 %v87_v3  ;;  %v83_v11 = vld [vmem:[%s833_s1 + $0xd0] sm:$0xff]  ;;  %v66_v12 = vld [vmem:[%s833_s1 + $0x48] sm:$0xff]  ;;  %v65_v14 = vld [vmem:[%s833_s1 + $0x40] sm:$0xff] }
   0xb   :  { %95 = vmatpush.msra.mxu0 %v70_v4  ;;  %v82_v13 = vld [vmem:[%s833_s1 + $0xc8] sm:$0xff]  ;;  %v81_v15 = vld [vmem:[%s833_s1 + $0xc0] sm:$0xff]  ;;  %v64_v16 = vld [vmem:[%s833_s1 + $0x38] sm:$0xff] }
   0xc   :  { %115 = vmatpush.msra.mxu1 %v86_v5  ;;  %v80_v17 = vld [vmem:[%s833_s1 + $0xb8] sm:$0xff]  ;;  %v63_v18 = vld [vmem:[%s833_s1 + $0x30] sm:$0xff]  ;;  %v62_v20 = vld [vmem:[%s833_s1 + $0x28] sm:$0xff] }
   0xd   :  { %96 = vmatpush.msra.mxu0 %v69_v6  ;;  %v79_v19 = vld [vmem:[%s833_s1 + $0xb0] sm:$0xff]  ;;  %v78_v21 = vld [vmem:[%s833_s1 + $0xa8] sm:$0xff]  ;;  %v61_v22 = vld [vmem:[%s833_s1 + $0x20] sm:$0xff] }
   0xe   :  { %116 = vmatpush.msra.mxu1 %v85_v7  ;;  %v77_v23 = vld [vmem:[%s833_s1 + $0xa0] sm:$0xff]  ;;  %v60_v24 = vld [vmem:[%s833_s1 + $0x18] sm:$0xff]  ;;  %v59_v26 = vld [vmem:[%s833_s1 + $0x10] sm:$0xff] }
   0xf   :  { %97 = vmatpush.msra.mxu0 %v68_v8  ;;  %v76_v25 = vld [vmem:[%s833_s1 + $0x98] sm:$0xff]  ;;  %v75_v27 = vld [vmem:[%s833_s1 + $0x90] sm:$0xff]  ;;  %v58_v28 = vld [vmem:[%s833_s1 + $0x8] sm:$0xff] }
  0x10   :  { %117 = vmatpush.msra.mxu1 %v84_v9  ;;  %v74_v29 = vld [vmem:[%s833_s1 + $0x88] sm:$0xff]  ;;  %v57_v30 = vld [vmem:[%s833_s1] sm:$0xff]  ;;  %v155_v34 = vld [vmem:[%s835_s3 + $0x18] sm:$0xff] }
  0x11   :  { %98 = vmatpush.msra.mxu0 %v67_v10  ;;  %v73_v31 = vld [vmem:[%s833_s1 + $0x80] sm:$0xff]  ;;  %v56_v33 = vld [vmem:[%s832_s0 + $0x8] sm:$0xff]  ;;  %v154_v35 = vld [vmem:[%s835_s3 + $0x10] sm:$0xff]  ;;  %176 = vmatpush.msra.mxu2 %v155_v34 }
  0x12   :  { %118 = vmatpush.msra.mxu1 %v83_v11  ;;  %v55_v32 = vld [vmem:[%s832_s0] sm:$0xff]  ;;  %v153_v36 = vld [vmem:[%s835_s3 + $0x8] sm:$0xff]  ;;  %v257_v9 = vld [vmem:[%s839_s7 + $0x30] sm:$0xff]  ;;  %s606_s0 = smov [#allocation5]  }
  0x13   :  { %99 = vmatpush.msra.mxu0 %v66_v12  ;;  %177 = vmatpush.msra.mxu2 %v154_v35  ;;  %v152_v37 = vld [vmem:[%s835_s3] sm:$0xff]  ;;  %v258_v10 = vld [vmem:[%s839_s7 + $0x38] sm:$0xff]  ;;  %v256_v12 = vld [vmem:[%s839_s7 + $0x28] sm:$0xff]  ;;  %s503_s18 = sshll.u32 %s606_s0, 4  ;;  %s505_s3 = sshll.u32 %s843_s11, 4  ;;  %s504_s18 = int_to_ptr.vmem [resolvable:$true] %s503_s18  ;;  %s506_s3 = int_to_ptr.hbm [resolvable:$true] %s505_s3 }
  0x14   :  { %119 = vmatpush.msra.mxu1 %v82_v13  ;;  %v528_v38 = vld [vmem:[%s834_s2] ss:$0 sm:$0xff]  ;;  %v253_v13 = vld [vmem:[%s839_s7 + $0x10] sm:$0xff]  ;;  %v377_v35 = vld [vmem:[#allocation2 + $0xf8] sm:$0xff] }
  0x15   :  { %100 = vmatpush.msra.mxu0 %v65_v14  ;;  %178 = vmatpush.msra.mxu2 %v153_v36  ;;  %v203_v56 = vld [vmem:[%s837_s5] sm:$0xff]  ;;  %v254_v14 = vld [vmem:[%s839_s7 + $0x18] sm:$0xff]  ;;  %v408_v34 = vld [vmem:[#allocation2 + $0x1f0] sm:$0xff] }
  0x16   :  { %120 = vmatpush.msra.mxu1 %v81_v15  ;;  %227 = vmatpush.msra.mxu3 %v203_v56  ;;  %v529_v57 = vld [vmem:[%s836_s4] ss:$0 sm:$0xff]  ;;  %v409_v36 = vld [vmem:[#allocation2 + $0x1f8] sm:$0xff]  ;;  %v399_v56 = vld [vmem:[#allocation2 + $0x1a8] sm:$0xff] }
  0x17   :  { %101 = vmatpush.msra.mxu0 %v64_v16  ;;  %179 = vmatpush.msra.mxu2 %v152_v37  ;;  %v255_v11 = vld [vmem:[%s839_s7 + $0x20] sm:$0xff]  ;;  %v252_v16 = vld [vmem:[%s839_s7 + $0x8] sm:$0xff] }
  0x18   :  { %121 = vmatpush.msra.mxu1 %v80_v17  ;;  %280 = vmatpush.msrb.mxu3 %v257_v9  ;;  %v251_v15 = vld [vmem:[%s839_s7] sm:$0xff]  ;;  %v356_v9 = vld [vmem:[#allocation2 + $0x50] sm:$0xff] }
  0x19   :  { %102 = vmatpush.msra.mxu0 %v63_v18  ;;  %300 = vmatpush.msrb.mxu2 %v258_v10  ;;  %v530_v17 = vld [vmem:[%s838_s6] ss:$0 sm:$0xff]  ;;  %v388_v10 = vld [vmem:[#allocation2 + $0x150] sm:$0xff] }
  0x1a   :  { %122 = vmatpush.msra.mxu1 %v79_v19  ;;  %281 = vmatpush.msrb.mxu3 %v255_v11  ;;  %v374_v37 = vld [vmem:[#allocation2 + $0xe0] sm:$0xff]  ;;  %v357_v11 = vld [vmem:[#allocation2 + $0x58] sm:$0xff] }
  0x1b   :  { %103 = vmatpush.msra.mxu0 %v62_v20  ;;  %301 = vmatpush.msrb.mxu2 %v256_v12  ;;  %v389_v12 = vld [vmem:[#allocation2 + $0x158] sm:$0xff] }
  0x1c   :  { %123 = vmatpush.msra.mxu1 %v78_v21  ;;  %282 = vmatpush.msrb.mxu3 %v253_v13  ;;  %v354_v13 = vld [vmem:[#allocation2 + $0x40] sm:$0xff] }
  0x1d   :  { %104 = vmatpush.msra.mxu0 %v61_v22  ;;  %302 = vmatpush.msrb.mxu2 %v254_v14  ;;  %v386_v14 = vld [vmem:[#allocation2 + $0x140] sm:$0xff] }
  0x1e   :  { %124 = vmatpush.msra.mxu1 %v77_v23  ;;  %283 = vmatpush.msrb.mxu3 %v251_v15  ;;  %v355_v15 = vld [vmem:[#allocation2 + $0x48] sm:$0xff] }
  0x1f   :  { %105 = vmatpush.msra.mxu0 %v60_v24  ;;  %303 = vmatpush.msrb.mxu2 %v252_v16  ;;  %v387_v16 = vld [vmem:[#allocation2 + $0x148] sm:$0xff] }
  0x20   :  { %125 = vmatpush.msra.mxu1 %v76_v25 }
  0x21   :  { %106 = vmatpush.msra.mxu0 %v59_v26 }
  0x22   :  { %126 = vmatpush.msra.mxu1 %v75_v27 }
  0x23   :  { %107 = vmatpush.msra.mxu0 %v58_v28 }
  0x24   :  { %127 = vmatpush.msra.mxu1 %v74_v29 }
  0x25   :  { %108 = vmatpush.msra.mxu0 %v57_v30 }
  0x26   :  { %128 = vmatpush.msra.mxu1 %v73_v31  ;;  %109 = vmatmul.f32.vlgmr.msra.gmra.mxu0 %v55_v32 }
  0x27   :  { %129 = vmatmul.f32.vlgmr.msra.gmra.mxu1 %v56_v33  ;;  %v376_v33 = vld [vmem:[#allocation2 + $0xf0] sm:$0xff]  ;;  %456 = vmatpush.msrb.mxu0 %v377_v35  ;;  %v379_v35 = vld [vmem:[#allocation2 + $0x108] sm:$0xff] }
  0x28   :  { %476 = vmatpush.msrb.mxu1 %v409_v36 }
  0xa3   :  { %v110_v39 = vpop.f32.mrf.mxu0 }
  0xa4   :  { %v130_v40 = vpop.f32.mrf.mxu1  ;;  %v111_v41 = vadd.f32 %v528_v38, %v110_v39  ;;  %v406_v38 = vld [vmem:[#allocation2 + $0x1e0] sm:$0xff]  ;;  %v375_v39 = vld [vmem:[#allocation2 + $0xe8] sm:$0xff] }
  0xa5   :  { %457 = vmatpush.msrb.mxu0 %v375_v39 }
  0xa6   :  { %v131_v42 = vadd.f32 %v130_v40, %v111_v41  ;;  %v407_v40 = vld [vmem:[#allocation2 + $0x1e8] sm:$0xff]  ;;  %v372_v41 = vld [vmem:[#allocation2 + $0xd0] sm:$0xff] }
  0xa7   :  { %477 = vmatpush.msrb.mxu1 %v407_v40 }
  0xa8   :  { %v515_v43 = vmul.f32 -1.442695, %v131_v42  ;;  %v404_v42 = vld [vmem:[#allocation2 + $0x1d0] sm:$0xff] }
  0xaa   :  { %531 = vpow2.f32 %v515_v43  ;;  %v373_v43 = vld [vmem:[#allocation2 + $0xd8] sm:$0xff] }
  0xab   :  { %458 = vmatpush.msrb.mxu0 %v373_v43 }
  0xb0   :  { %v532_v44 = vpop.eup %531 }
  0xb1   :  { %v136_v45 = vadd.f32 1.0, %v532_v44  ;;  %v405_v44 = vld [vmem:[#allocation2 + $0x1d8] sm:$0xff] }
  0xb2   :  { %478 = vmatpush.msrb.mxu1 %v405_v44 }
  0xb3   :  { %533 = vrcp.f32 %v136_v45  ;;  %v148_v49 = vand.u32 2147483648, %v136_v45  ;;  %v146_v51 = vand.u32 2147483647, %v136_v45  ;;  %vm142_vm1 = vweird.f32 %v136_v45 }
  0xb5   :  { %v149_v53 = vor.u32 1.1754944e-38, %v148_v49  ;;  %vm147_vm4 = vcmp.eq.f32.partialorder %v146_v51, 8.507059e+37  ;;  %v368_v49 = vld [vmem:[#allocation2 + $0xb0] sm:$0xff]  ;;  %v369_v51 = vld [vmem:[#allocation2 + $0xb8] sm:$0xff] }
  0xb9   :  { %v534_v46 = vpop.eup %533 }
  0xba   :  { %v138_v47 = vmul.f32 %v534_v46, %v136_v45  ;;  %vm143_vm0 = vweird.f32 %v534_v46  ;;  %v370_v45 = vld [vmem:[#allocation2 + $0xc0] sm:$0xff] }
  0xbb   :  { %vm144_vm2 = vmor %vm142_vm1, %vm143_vm0 }
  0xbc   :  { %v139_v48 = vsub.f32 1.0, %v138_v47  ;;  %v371_v47 = vld [vmem:[#allocation2 + $0xc8] sm:$0xff] }
  0xbd   :  { %459 = vmatpush.msrb.mxu0 %v371_v47 }
  0xbe   :  { %v140_v50 = vmul.f32 %v534_v46, %v139_v48  ;;  %v403_v48 = vld [vmem:[#allocation2 + $0x1c8] sm:$0xff] }
  0xbf   :  { %479 = vmatpush.msrb.mxu1 %v403_v48  ;;  %460 = vmatpush.msrb.mxu0 %v369_v51 }
  0xc0   :  { %v141_v52 = vadd.f32 %v534_v46, %v140_v50  ;;  %v400_v50 = vld [vmem:[#allocation2 + $0x1b0] sm:$0xff] }
  0xc2   :  { %v145_v54 = vsel %vm144_vm2, %v534_v46, %v141_v52  ;;  %v402_v46 = vld [vmem:[#allocation2 + $0x1c0] sm:$0xff]  ;;  %v401_v52 = vld [vmem:[#allocation2 + $0x1b8] sm:$0xff] }
  0xc3   :  { %v150_v55 = vsel %vm147_vm4, %v149_v53, %v145_v54  ;;  %480 = vmatpush.msrb.mxu1 %v401_v52  ;;  %v366_v53 = vld [vmem:[#allocation2 + $0xa0] sm:$0xff] }
  0xc4   :  { %516 = vmatmul.msk.f32.vlgmr.msra.gmra.mxu2 %vm160_vm3, %v150_v55  ;;  %v398_v54 = vld [vmem:[#allocation2 + $0x1a0] sm:$0xff]  ;;  %v367_v55 = vld [vmem:[#allocation2 + $0xa8] sm:$0xff] }
  0xc5   :  { %436 = vmatpush.msra.mxu2 %v408_v34  ;;  %461 = vmatpush.msrb.mxu0 %v367_v55  ;;  %v347_v34 = vld [vmem:[#allocation2 + $0x8] sm:$0xff] }
  0xc6   :  { %481 = vmatpush.msrb.mxu1 %v399_v56 }
  0xc7   :  { %437 = vmatpush.msra.mxu2 %v406_v38 }
  0xc9   :  { %438 = vmatpush.msra.mxu2 %v404_v42 }
  0xcb   :  { %439 = vmatpush.msra.mxu2 %v402_v46 }
  0xcd   :  { %440 = vmatpush.msra.mxu2 %v400_v50 }
  0xcf   :  { %441 = vmatpush.msra.mxu2 %v398_v54 }
 0x147   :  { %v181_v58 = vpop.f32.mrf.mxu2 }
 0x148   :  { %v182_v59 = vadd.f32 %v529_v57, %v181_v58  ;;  %v364_v57 = vld [vmem:[#allocation2 + $0x90] sm:$0xff] }
 0x149   :  { %v396_v58 = vld [vmem:[#allocation2 + $0x190] sm:$0xff] }
 0x14a   :  { %v517_v60 = vmul.f32 -1.442695, %v182_v59  ;;  %v365_v59 = vld [vmem:[#allocation2 + $0x98] sm:$0xff]  ;;  %442 = vmatpush.msra.mxu2 %v396_v58 }
 0x14b   :  { %462 = vmatpush.msrb.mxu0 %v365_v59 }
 0x14c   :  { %535 = vpow2.f32 %v517_v60  ;;  %v397_v60 = vld [vmem:[#allocation2 + $0x198] sm:$0xff] }
 0x14d   :  { %482 = vmatpush.msrb.mxu1 %v397_v60 }
 0x152   :  { %v536_v61 = vpop.eup %535 }
 0x153   :  { %v187_v62 = vadd.f32 1.0, %v536_v61  ;;  %v362_v61 = vld [vmem:[#allocation2 + $0x80] sm:$0xff] }
 0x155   :  { %537 = vrcp.f32 %v187_v62  ;;  %v199_v2 = vand.u32 2147483648, %v187_v62  ;;  %v197_v4 = vand.u32 2147483647, %v187_v62  ;;  %vm193_vm6 = vweird.f32 %v187_v62 }
 0x157   :  { %v200_v6 = vor.u32 1.1754944e-38, %v199_v2  ;;  %vm198_vm9 = vcmp.eq.f32.partialorder %v197_v4, 8.507059e+37  ;;  %v392_v2 = vld [vmem:[#allocation2 + $0x170] sm:$0xff]  ;;  %v393_v4 = vld [vmem:[#allocation2 + $0x178] sm:$0xff] }
 0x15b   :  { %v538_v63 = vpop.eup %537 }
 0x15c   :  { %v189_v0 = vmul.f32 %v538_v63, %v187_v62  ;;  %vm194_vm5 = vweird.f32 %v538_v63  ;;  %v394_v62 = vld [vmem:[#allocation2 + $0x180] sm:$0xff] }
 0x15d   :  { %vm195_vm7 = vmor %vm193_vm6, %vm194_vm5  ;;  %443 = vmatpush.msra.mxu2 %v394_v62 }
 0x15e   :  { %v190_v1 = vsub.f32 1.0, %v189_v0  ;;  %v395_v0 = vld [vmem:[#allocation2 + $0x188] sm:$0xff] }
 0x15f   :  { %483 = vmatpush.msrb.mxu1 %v395_v0  ;;  %444 = vmatpush.msra.mxu2 %v392_v2  ;;  %v410_v2 = vld [vmem:[%s842_s10] sm:$0x3] }
 0x160   :  { %v191_v3 = vmul.f32 %v538_v63, %v190_v1  ;;  %v360_v1 = vld [vmem:[#allocation2 + $0x70] sm:$0xff] }
 0x161   :  { %484 = vmatpush.msrb.mxu1 %v393_v4 }
 0x162   :  { %v192_v5 = vadd.f32 %v538_v63, %v191_v3  ;;  %v361_v3 = vld [vmem:[#allocation2 + $0x78] sm:$0xff] }
 0x164   :  { %v196_v7 = vsel %vm195_vm7, %v538_v63, %v192_v5  ;;  %v363_v63 = vld [vmem:[#allocation2 + $0x88] sm:$0xff]  ;;  %v358_v5 = vld [vmem:[#allocation2 + $0x60] sm:$0xff] }
 0x165   :  { %v201_v8 = vsel %vm198_vm9, %v200_v6, %v196_v7  ;;  %463 = vmatpush.msrb.mxu0 %v363_v63  ;;  %v390_v6 = vld [vmem:[#allocation2 + $0x160] sm:$0xff]  ;;  %v359_v7 = vld [vmem:[#allocation2 + $0x68] sm:$0xff] }
 0x166   :  { %518 = vmatmul.msk.f32.vlgmr.msra.gmra.mxu3 %vm208_vm8, %v201_v8  ;;  %v391_v8 = vld [vmem:[#allocation2 + $0x168] sm:$0xff]  ;;  %445 = vmatpush.msra.mxu2 %v390_v6 }
 0x167   :  { %416 = vmatpush.msra.mxu3 %v376_v33  ;;  %464 = vmatpush.msrb.mxu0 %v361_v3  ;;  %v413_v3 = vperm.slane %v410_v2, 1 }
 0x168   :  { %485 = vmatpush.msrb.mxu1 %v391_v8  ;;  %446 = vmatpush.msra.mxu2 %v388_v10  ;;  %v412_v8 = vperm.slane %v410_v2, 0 }
 0x169   :  { %417 = vmatpush.msra.mxu3 %v374_v37  ;;  %465 = vmatpush.msrb.mxu0 %v359_v7 }
 0x16a   :  { %486 = vmatpush.msrb.mxu1 %v389_v12  ;;  %447 = vmatpush.msra.mxu2 %v386_v14 }
 0x16b   :  { %418 = vmatpush.msra.mxu3 %v372_v41  ;;  %466 = vmatpush.msrb.mxu0 %v357_v11 }
 0x16c   :  { %487 = vmatpush.msrb.mxu1 %v387_v16 }
 0x16d   :  { %419 = vmatpush.msra.mxu3 %v370_v45  ;;  %467 = vmatpush.msrb.mxu0 %v355_v15 }
 0x16f   :  { %420 = vmatpush.msra.mxu3 %v368_v49 }
 0x171   :  { %421 = vmatpush.msra.mxu3 %v366_v53 }
 0x173   :  { %422 = vmatpush.msra.mxu3 %v364_v57 }
 0x175   :  { %423 = vmatpush.msra.mxu3 %v362_v61 }
 0x177   :  { %424 = vmatpush.msra.mxu3 %v360_v1 }
 0x179   :  { %425 = vmatpush.msra.mxu3 %v358_v5 }
 0x17b   :  { %426 = vmatpush.msra.mxu3 %v356_v9 }
 0x17d   :  { %427 = vmatpush.msra.mxu3 %v354_v13 }
 0x1e9   :  { %v229_v18 = vpop.f32.mrf.mxu3 }
 0x1ea   :  { %v230_v19 = vadd.f32 %v530_v17, %v229_v18  ;;  %v352_v17 = vld [vmem:[#allocation2 + $0x30] sm:$0xff] }
 0x1eb   :  { %v384_v18 = vld [vmem:[#allocation2 + $0x130] sm:$0xff]  ;;  %428 = vmatpush.msra.mxu3 %v352_v17 }
 0x1ec   :  { %v519_v20 = vmul.f32 -1.442695, %v230_v19  ;;  %v353_v19 = vld [vmem:[#allocation2 + $0x38] sm:$0xff]  ;;  %448 = vmatpush.msra.mxu2 %v384_v18 }
 0x1ed   :  { %468 = vmatpush.msrb.mxu0 %v353_v19 }
 0x1ee   :  { %539 = vpow2.f32 %v519_v20  ;;  %v385_v20 = vld [vmem:[#allocation2 + $0x138] sm:$0xff] }
 0x1ef   :  { %488 = vmatpush.msrb.mxu1 %v385_v20 }
 0x1f4   :  { %v540_v21 = vpop.eup %539 }
 0x1f5   :  { %v235_v22 = vadd.f32 1.0, %v540_v21  ;;  %v350_v21 = vld [vmem:[#allocation2 + $0x20] sm:$0xff] }
 0x1f6   :  { %429 = vmatpush.msra.mxu3 %v350_v21 }
 0x1f7   :  { %541 = vrcp.f32 %v235_v22  ;;  %v247_v26 = vand.u32 2147483648, %v235_v22  ;;  %v245_v28 = vand.u32 2147483647, %v235_v22  ;;  %vm241_vm11 = vweird.f32 %v235_v22 }
 0x1f9   :  { %v248_v30 = vor.u32 1.1754944e-38, %v247_v26  ;;  %vm246_vm13 = vcmp.eq.f32.partialorder %v245_v28, 8.507059e+37  ;;  %v348_v26 = vld [vmem:[#allocation2 + $0x10] sm:$0xff]  ;;  %v349_v28 = vld [vmem:[#allocation2 + $0x18] sm:$0xff] }
 0x1fa   :  { %430 = vmatpush.msra.mxu3 %v348_v26 }
 0x1fd   :  { %v542_v23 = vpop.eup %541 }
 0x1fe   :  { %v237_v24 = vmul.f32 %v542_v23, %v235_v22  ;;  %vm242_vm10 = vweird.f32 %v542_v23  ;;  %v382_v22 = vld [vmem:[#allocation2 + $0x120] sm:$0xff] }
 0x1ff   :  { %vm243_vm12 = vmor %vm241_vm11, %vm242_vm10  ;;  %449 = vmatpush.msra.mxu2 %v382_v22 }
 0x200   :  { %v238_v25 = vsub.f32 1.0, %v237_v24  ;;  %v383_v24 = vld [vmem:[#allocation2 + $0x128] sm:$0xff] }
 0x201   :  { %489 = vmatpush.msrb.mxu1 %v383_v24 }
 0x202   :  { %v239_v27 = vmul.f32 %v542_v23, %v238_v25  ;;  %v259_v25 = vld [vmem:[%s840_s8] sm:$0x3] }
 0x203   :  { %v262_v33 = vperm.slane %v259_v25, 1 }
 0x204   :  { %v240_v29 = vadd.f32 %v542_v23, %v239_v27  ;;  %v380_v27 = vld [vmem:[#allocation2 + $0x110] sm:$0xff] }
 0x205   :  { %450 = vmatpush.msra.mxu2 %v380_v27 }
 0x206   :  { %v244_v31 = vsel %vm243_vm12, %v542_v23, %v240_v29  ;;  %v351_v23 = vld [vmem:[#allocation2 + $0x28] sm:$0xff]  ;;  %v381_v29 = vld [vmem:[#allocation2 + $0x118] sm:$0xff] }
 0x207   :  { %v249_v32 = vsel %vm246_vm13, %v248_v30, %v244_v31  ;;  %469 = vmatpush.msrb.mxu0 %v351_v23  ;;  %v346_v30 = vld [vmem:[#allocation2] sm:$0xff]  ;;  %490 = vmatpush.msrb.mxu1 %v381_v29 }
 0x208   :  { %520 = vmatmul.msk.f32.vlgmr.msrb.gmra.mxu3 %vm160_vm3, %v249_v32  ;;  %521 = vmatmul.msk.f32.vlgmr.msrb.gmra.mxu2 %vm160_vm3, %v249_v32  ;;  %v378_v31 = vld [vmem:[#allocation2 + $0x100] sm:$0xff]  ;;  %v261_v32 = vperm.slane %v259_v25, 0 }
 0x209   :  { %470 = vmatpush.msrb.mxu0 %v349_v28  ;;  %431 = vmatpush.msra.mxu3 %v346_v30 }
 0x20a   :  { %451 = vmatpush.msra.mxu2 %v378_v31  ;;  %491 = vmatpush.msrb.mxu1 %v379_v35 }
 0x20b   :  { %471 = vmatpush.msrb.mxu0 %v347_v34 }
 0x28b   :  { %v285_v36 = vpop.f32.mrf.mxu3  ;;  %v305_v37 = vpop.f32.mrf.mxu2 }
 0x28c   :  { %v286_v38 = vadd.f32 %v285_v36, %v261_v32  ;;  %v306_v39 = vadd.f32 %v305_v37, %v262_v33 }
 0x28e   :  { %v522_v40 = vmul.f32 -1.442695, %v286_v38  ;;  %v523_v41 = vmul.f32 -1.442695, %v306_v39 }
 0x290   :  { %543 = vpow2.f32 %v522_v40 }
 0x291   :  { %545 = vpow2.f32 %v523_v41 }
 0x296   :  { %v544_v42 = vpop.eup %543 }
 0x297   :  { %v546_v43 = vpop.eup %545  ;;  %v314_v44 = vadd.f32 1.0, %v544_v42 }
 0x298   :  { %v315_v45 = vadd.f32 1.0, %v546_v43 }
 0x299   :  { %547 = vrcp.f32 %v314_v44  ;;  %v327_v51 = vand.u32 2147483648, %v314_v44  ;;  %v325_v54 = vand.u32 2147483647, %v314_v44  ;;  %vm321_vm0 = vweird.f32 %v314_v44 }
 0x29a   :  { %549 = vrcp.f32 %v315_v45  ;;  %v342_v55 = vand.u32 2147483648, %v315_v45  ;;  %v340_v57 = vand.u32 2147483647, %v315_v45  ;;  %vm336_vm2 = vweird.f32 %v315_v45 }
 0x29b   :  { %v328_v59 = vor.u32 1.1754944e-38, %v327_v51  ;;  %vm326_vm3 = vcmp.eq.f32.partialorder %v325_v54, 8.507059e+37 }
 0x29c   :  { %v343_v62 = vor.u32 1.1754944e-38, %v342_v55  ;;  %vm341_vm5 = vcmp.eq.f32.partialorder %v340_v57, 8.507059e+37 }
 0x29f   :  { %v548_v46 = vpop.eup %547 }
 0x2a0   :  { %v550_v47 = vpop.eup %549  ;;  %v317_v48 = vmul.f32 %v548_v46, %v314_v44  ;;  %vm322_vm14 = vweird.f32 %v548_v46 }
 0x2a1   :  { %v332_v49 = vmul.f32 %v550_v47, %v315_v45  ;;  %vm337_vm15 = vweird.f32 %v550_v47  ;;  %vm323_vm1 = vmor %vm321_vm0, %vm322_vm14 }
 0x2a2   :  { %v318_v50 = vsub.f32 1.0, %v317_v48  ;;  %vm338_vm4 = vmor %vm336_vm2, %vm337_vm15 }
 0x2a3   :  { %v333_v52 = vsub.f32 1.0, %v332_v49 }
 0x2a4   :  { %v319_v53 = vmul.f32 %v548_v46, %v318_v50 }
 0x2a5   :  { %v334_v56 = vmul.f32 %v550_v47, %v333_v52 }
 0x2a6   :  { %v320_v58 = vadd.f32 %v548_v46, %v319_v53 }
 0x2a7   :  { %v335_v60 = vadd.f32 %v550_v47, %v334_v56 }
 0x2a8   :  { %v324_v61 = vsel %vm323_vm1, %v548_v46, %v320_v58 }
 0x2a9   :  { %v329_v63 = vsel %vm326_vm3, %v328_v59, %v324_v61  ;;  %v339_v0 = vsel %vm338_vm4, %v550_v47, %v335_v60 }
 0x2aa   :  { %432 = vmatmul.f32.vlgmr.msra.gmra.mxu3 %v329_v63  ;;  %v344_v1 = vsel %vm341_vm5, %v343_v62, %v339_v0  ;;  %472 = vmatmul.f32.vlgmr.msrb.gmra.mxu0 %v329_v63 }
 0x2ab   :  { %452 = vmatmul.f32.vlgmr.msra.gmra.mxu2 %v344_v1  ;;  %492 = vmatmul.f32.vlgmr.msrb.gmra.mxu1 %v344_v1 }
 0x327   :  { %v473_v4 = vpop.f32.mrf.mxu0 }
 0x328   :  { %v474_v5 = vadd.f32 %v473_v4, %v413_v3  ;;  %v493_v6 = vpop.f32.mrf.mxu1 }
 0x32a   :  { %v494_v7 = vadd.f32 %v493_v6, %v474_v5 }
 0x32c   :  { %497 = vst [vmem:[#allocation5 + $0x8] sm:$0xff] %v494_v7 }
 0x32d   :  { %v433_v9 = vpop.f32.mrf.mxu3 }
 0x32e   :  { %v434_v10 = vadd.f32 %v433_v9, %v412_v8  ;;  %v453_v11 = vpop.f32.mrf.mxu2 }
 0x330   :  { %v454_v12 = vadd.f32 %v453_v11, %v434_v10 }
 0x332   :  { %496 = vst [vmem:[#allocation5] sm:$0xff] %v454_v12 }
 0x333   :  { %508 = dma.vmem_to_hbm [thread:$0]  %s504_s18, 256, %s506_s3, [#allocation4]  }
 0x334   :  { %601 = dma.done.wait [#allocation4], 256  }
 0x335   :  { %602 = vsyncadd [#allocation4], 4294967040 }
 0x336   :  { %513 = vsyncpa [#allocation3], 1 }
 0x337   :  { %514 = vsyncpa [#allocation4], 1 }

</bundles_post_ra>
